<compile_context>
chip_gen: v7x
topology: tpu7x:2x2x1
jax: 0.10.0
libtpu: 0.0.40
codegen_flags: <defaults>
</compile_context>

<pallas_src>
import functools

import jax
import jax.numpy as jnp
from jax.experimental import pallas as pl
from jax.experimental.pallas import tpu as pltpu

_LANES = 128


def _round_up(v, m):
    return (v + m - 1) // m * m


def _dyn_bn_kernel(x_ref, w_ref, b_ref, o_ref, *, eps, inv_n):
    # x_ref/o_ref: (N, TF) feature tile; w_ref/b_ref: (1, TF).
    x = x_ref[...].astype(jnp.float32)
    mean = jnp.sum(x, axis=0, keepdims=True) * inv_n               # (1, TF)
    xc = x - mean
    # Centered (biased) variance: avoids E[x^2] - mean^2 cancellation.
    var = jnp.sum(xc * xc, axis=0, keepdims=True) * inv_n          # (1, TF)
    inv_std = jax.lax.rsqrt(var + eps)
    # Fold affine into per-feature scale/shift; output path is mul+add only.
    scale = w_ref[...].astype(jnp.float32) * inv_std               # (1, TF)
    shift = b_ref[...].astype(jnp.float32) - mean * scale          # (1, TF)
    o_ref[...] = (x * scale + shift).astype(o_ref.dtype)


def _pick_feature_tile(n, f_pad, budget_bytes):
    # Rough working set per grid step: double-buffered input + output tiles
    # plus f32 working copies ~ 6 * N * TF * 4 bytes.
    for tf in (1024, 512, 256, 128):
        if f_pad % tf == 0 and 6 * n * tf * 4 <= budget_bytes:
            return tf
    return _LANES  # f_pad is always a multiple of 128


def dynamic_batch_norm_forward(x, weight, bias, eps=1e-5):
    """Forward of DynamicBatchNorm (training-mode batch statistics).

    x:      (N, F) float array, F <= c
    weight: (c,)   BN scale (gamma)
    bias:   (c,)   BN shift  (beta)
    """
    n, f = x.shape
    c = weight.shape[0]
    assert f <= c, "runtime feature width must not exceed the module max c"

    # Pad the feature axis to the module max rounded up to 128 lanes.  Padded
    # columns are all-zero (finite results) and sliced off before returning.
    f_pad = _round_up(c, _LANES)
    x_p = x if f == f_pad else jnp.pad(x, ((0, 0), (0, f_pad - f)))
    w_p = jnp.pad(weight.astype(jnp.float32), (0, f_pad - c),
                  constant_values=1.0).reshape(1, f_pad)
    b_p = jnp.pad(bias.astype(jnp.float32), (0, f_pad - c)).reshape(1, f_pad)

    # Tile budget sized for the smallest VMEM generation (v7x: 64 MiB physical).
    budget = 40 * 1024 * 1024
    tf = _pick_feature_tile(n, f_pad, budget)
    grid = (f_pad // tf,)

    # Raise the scoped VMEM limit above the 16/32 MiB defaults when needed,
    # but stay well inside v7x's 64 MiB physical VMEM.
    vmem_limit = int(min(6 * n * tf * 4 + (8 << 20), 56 << 20))

    kernel = functools.partial(_dyn_bn_kernel, eps=float(eps),
                               inv_n=1.0 / float(n))

    out = pl.pallas_call(
        kernel,
        out_shape=jax.ShapeDtypeStruct((n, f_pad), x.dtype),
        grid=grid,
        in_specs=[
            pl.BlockSpec((n, tf), lambda j: (0, j)),
            pl.BlockSpec((1, tf), lambda j: (0, j)),
            pl.BlockSpec((1, tf), lambda j: (0, j)),
        ],
        out_specs=pl.BlockSpec((n, tf), lambda j: (0, j)),
        compiler_params=pltpu.CompilerParams(
            dimension_semantics=("parallel",),   # megacore sharding on v7x
            vmem_limit_bytes=vmem_limit,
        ),
    )(x_p, w_p, b_p)

    return out[:, :f] if f != f_pad else out


def _reference_forward(x, weight, bias, eps=1e-5):
    # Pure-JAX reference of F.batch_norm(training=True) with sliced params.
    n, f = x.shape
    mean = jnp.mean(x, axis=0, keepdims=True)
    var = jnp.mean((x - mean) ** 2, axis=0, keepdims=True)  # biased
    return (x - mean) / jnp.sqrt(var + eps) * weight[:f][None, :] + bias[:f][None, :]


if __name__ == "__main__":
    key = jax.random.PRNGKey(0)
    kx, kw, kb = jax.random.split(key, 3)

    c = 32          # max channels of the DynamicBatchNorm module
    N = 8           # batch
    F = 16          # runtime (dynamic) feature width, F < c -> sliced-param branch
    eps = 1e-5

    # Non-trivial affine parameters to exercise the folded scale/shift path.
    weight = 1.0 + 0.1 * jax.random.normal(kw, (c,), dtype=jnp.float32)
    bias = 0.1 * jax.random.normal(kb, (c,), dtype=jnp.float32)
    x = jax.random.normal(kx, (N, F), dtype=jnp.float32)

    out = dynamic_batch_norm_forward(x, weight, bias, eps=eps)
    out = jax.block_until_ready(out)

    ref = _reference_forward(x, weight, bias, eps=eps)
    assert out.shape == (N, F) and out.dtype == x.dtype
    assert jnp.allclose(out, ref, atol=1e-5, rtol=1e-5), "mismatch vs reference"

    print("KERNEL_OK")
</pallas_src>

<mosaic_0001>
module attributes {stable_mosaic.version = 11 : i64} {
  func.func @_dyn_bn_kernel(%arg0: i32, %arg1: memref<8x128xf32, #tpu.memory_space<vmem>>, %arg2: memref<1x128xf32, #tpu.memory_space<vmem>>, %arg3: memref<1x128xf32, #tpu.memory_space<vmem>>, %arg4: memref<8x128xf32, #tpu.memory_space<vmem>>) attributes {dimension_semantics = [#tpu.dimension_semantics<parallel>], iteration_bounds = array<i64: 1>, scalar_prefetch = 0 : i64, scratch_operands = 0 : i64, tpu.core_type = #tpu.core_type<tc>, window_params = [{transform_indices = @transform_0, window_bounds = array<i64: 8, 128>}, {transform_indices = @transform_1, window_bounds = array<i64: 1, 128>}, {transform_indices = @transform_2, window_bounds = array<i64: 1, 128>}, {transform_indices = @transform_3, window_bounds = array<i64: 8, 128>}]} {
    %c0 = arith.constant 0 : index
    %c0_0 = arith.constant 0 : index
    %0 = vector.load %arg1[%c0, %c0_0] : memref<8x128xf32, #tpu.memory_space<vmem>>, vector<8x128xf32>
    %cst = arith.constant dense<0.000000e+00> : vector<128xf32>
    %1 = vector.multi_reduction <add>, %0, %cst [0] : vector<8x128xf32> to vector<128xf32>
    %2 = vector.shape_cast %1 : vector<128xf32> to vector<1x128xf32>
    %cst_1 = arith.constant 1.250000e-01 : f32
    %3 = vector.broadcast %cst_1 : f32 to vector<1x128xf32>
    %4 = arith.mulf %2, %3 : vector<1x128xf32>
    %5 = vector.broadcast %4 : vector<1x128xf32> to vector<8x128xf32>
    %6 = arith.subf %0, %5 : vector<8x128xf32>
    %7 = arith.mulf %6, %6 : vector<8x128xf32>
    %cst_2 = arith.constant dense<0.000000e+00> : vector<128xf32>
    %8 = vector.multi_reduction <add>, %7, %cst_2 [0] : vector<8x128xf32> to vector<128xf32>
    %9 = vector.shape_cast %8 : vector<128xf32> to vector<1x128xf32>
    %cst_3 = arith.constant 1.250000e-01 : f32
    %10 = vector.broadcast %cst_3 : f32 to vector<1x128xf32>
    %11 = arith.mulf %9, %10 : vector<1x128xf32>
    %cst_4 = arith.constant 9.99999974E-6 : f32
    %12 = vector.broadcast %cst_4 : f32 to vector<1x128xf32>
    %13 = arith.addf %11, %12 : vector<1x128xf32>
    %14 = math.rsqrt %13 : vector<1x128xf32>
    %c0_5 = arith.constant 0 : index
    %c0_6 = arith.constant 0 : index
    %15 = vector.load %arg2[%c0_5, %c0_6] : memref<1x128xf32, #tpu.memory_space<vmem>>, vector<1x128xf32>
    %16 = arith.mulf %15, %14 : vector<1x128xf32>
    %c0_7 = arith.constant 0 : index
    %c0_8 = arith.constant 0 : index
    %17 = vector.load %arg3[%c0_7, %c0_8] : memref<1x128xf32, #tpu.memory_space<vmem>>, vector<1x128xf32>
    %18 = arith.mulf %4, %16 : vector<1x128xf32>
    %19 = arith.subf %17, %18 : vector<1x128xf32>
    %20 = vector.broadcast %16 : vector<1x128xf32> to vector<8x128xf32>
    %21 = arith.mulf %0, %20 : vector<8x128xf32>
    %22 = vector.broadcast %19 : vector<1x128xf32> to vector<8x128xf32>
    %23 = arith.addf %21, %22 : vector<8x128xf32>
    %c0_9 = arith.constant 0 : index
    %c0_10 = arith.constant 0 : index
    %24 = vector.load %arg4[%c0_9, %c0_10] : memref<8x128xf32, #tpu.memory_space<vmem>>, vector<8x128xf32>
    tpu.vector_store %arg4[%c0_9, %c0_10], %23 {strides = array<i32>} : memref<8x128xf32, #tpu.memory_space<vmem>>, vector<8x128xf32>,
    return
  }
  func.func @transform_0(%arg0: i32) -> (i32, i32) {
    %c0_i32 = arith.constant 0 : i32
    %c0_i32_0 = arith.constant 0 : i32
    return %c0_i32, %arg0 : i32, i32
  }
  func.func @transform_1(%arg0: i32) -> (i32, i32) {
    %c0_i32 = arith.constant 0 : i32
    %c0_i32_0 = arith.constant 0 : i32
    return %c0_i32, %arg0 : i32, i32
  }
  func.func @transform_2(%arg0: i32) -> (i32, i32) {
    %c0_i32 = arith.constant 0 : i32
    %c0_i32_0 = arith.constant 0 : i32
    return %c0_i32, %arg0 : i32, i32
  }
  func.func @transform_3(%arg0: i32) -> (i32, i32) {
    %c0_i32 = arith.constant 0 : i32
    %c0_i32_0 = arith.constant 0 : i32
    return %c0_i32, %arg0 : i32, i32
  }
}

</mosaic_0001>

<bundles_post_ra>
// kernel: tpu_custom_call.1
= control target key start
LH: loop header
LB: loop body
LE: loop exit
PB: predicated region body
PF: predicated region fallthrough
CT: control target
= control target key end

     0   :  { %8 = vsyncpa [#allocation3], 0  ;;  %s185_s0 = inlined_call_operand.hbm [shape: f32[8,128], index: 0, kind: input, shape index: {}]   ;;  %s186_s1 = inlined_call_operand.vmem [shape: f32[1,128], index: 1, kind: input, shape index: {}]   ;;  %s187_s2 = inlined_call_operand.vmem [shape: f32[1,128], index: 2, kind: input, shape index: {}]   ;;  %s188_s3 = inlined_call_operand.hbm [shape: f32[8,128], index: 3, kind: output, shape index: {}]  }
   0x1   :  { %9 = vsyncpa [#allocation4], 0  ;;  %s133_s12 = smov [#allocation2]   ;;  %s85_s16 = scalar_lea.hbm %s185_s0, 128 }
   0x2   :  { %s16_s13 = sshll.u32 %s133_s12, 4  ;;  %p86_p0 = scmp.ne.s32.totalorder %s185_s0, %s85_s16  ;;  %s17_s13 = int_to_ptr.vmem [resolvable:$true] %s16_s13 }
   0x3   :  { %p89_p1 = scmp.lt.u32.totalorder %s85_s16, %s185_s0 }
   0x5   :  { %p91_p2 = pnand %p89_p1, %p86_p0 }
   0x7   :  { %94 = shalt.err (!%p91_p2)
}
   0x8   :  { %s95_s21 = scalar_lea.vmem %s17_s13, 128  ;;  %p100_p4 = scmp.lt.s32.totalorder %s17_s13, %s17_s13 }
   0x9   :  { %p96_p3 = scmp.ne.s32.totalorder %s17_s13, %s95_s21  ;;  %p101_p5 = scmp.lt.s32.totalorder %s95_s21, %s95_s21 }
   0xb   :  { %p102_p6 = por %p101_p5, %p100_p4 }
   0xd   :  { %p103_p7 = pnand %p102_p6, %p96_p3 }
   0xf   :  { %106 = shalt.err (!%p103_p7)
}
  0x10   :  { %19 = dma.hbm_to_vmem [thread:$0]  %s185_s0, 128, %s17_s13, [#allocation3]  }
  0x11   :  { %129 = dma.done.wait [#allocation3], 128  }
  0x12   :  { %130 = vsyncadd [#allocation3], 4294967168  ;;  %v27_v0 = vld [vmem:[#allocation2] sm:$0xff]  ;;  %v52_v18 = vlaneseq  ;;  %s134_s27 = smov [#allocation5]  }
  0x13   :  { %v28_v1 = vrot.slane %v27_v0, 4  ;;  %v46_v20 = vld [vmem:[%s186_s1] sm:$0x1]  ;;  %s72_s28 = sshll.u32 %s134_s27, 4  ;;  %s73_s28 = int_to_ptr.vmem [resolvable:$true] %s72_s28 }
  0x14   :  { %v53_v19 = vshrl.u32 %v52_v18, 7  ;;  %v48_v24 = vld [vmem:[%s187_s2] sm:$0x1]  ;;  %s107_s29 = scalar_lea.vmem %s73_s28, 128  ;;  %p112_p9 = scmp.lt.s32.totalorder %s73_s28, %s73_s28 }
  0x15   :  { %v29_v2 = vadd.f32 %v28_v1, %v27_v0  ;;  %p108_p8 = scmp.ne.s32.totalorder %s73_s28, %s107_s29  ;;  %p113_p10 = scmp.lt.s32.totalorder %s107_s29, %s107_s29 }
  0x16   :  { %v54_v21 = vsub.s32 0, %v53_v19 }
  0x17   :  { %v30_v3 = vrot.slane %v29_v2, 2  ;;  %p114_p11 = por %p113_p10, %p112_p9 }
  0x19   :  { %v31_v4 = vadd.f32 %v30_v3, %v29_v2  ;;  %p115_p12 = pnand %p114_p11, %p108_p8 }
  0x1b   :  { %v32_v5 = vrot.slane %v31_v4, 1 }
  0x1d   :  { %v33_v6 = vadd.f32 %v32_v5, %v31_v4 }
  0x1f   :  { %v34_v7 = vmul.f32 0.125, %v33_v6 }
  0x21   :  { %v35_v8 = vsub.f32 %v27_v0, %v34_v7 }
  0x23   :  { %v36_v9 = vmul.f32 %v35_v8, %v35_v8 }
  0x25   :  { %v37_v10 = vrot.slane %v36_v9, 4 }
  0x27   :  { %v38_v11 = vadd.f32 %v37_v10, %v36_v9 }
  0x29   :  { %v39_v12 = vrot.slane %v38_v11, 2 }
  0x2b   :  { %v40_v13 = vadd.f32 %v39_v12, %v38_v11 }
  0x2d   :  { %v41_v14 = vrot.slane %v40_v13, 1 }
  0x2f   :  { %v42_v15 = vadd.f32 %v41_v14, %v40_v13 }
  0x31   :  { %v43_v16 = vmul.f32 0.125, %v42_v15 }
  0x33   :  { %v44_v17 = vadd.f32 1e-05, %v43_v16 }
  0x35   :  { %83 = vrsqrt.f32 %v44_v17 }
  0x3f   :  { %v84_v22 = vpop.eup %83 }
  0x40   :  { %v47_v23 = vmul.f32 %v84_v22, %v46_v20 }
  0x42   :  { %v49_v25 = vmul.f32 %v47_v23, %v34_v7  ;;  %v55_v26 = vrot.slane %v47_v23, %v54_v21 }
  0x44   :  { %v50_v27 = vsub.f32 %v48_v24, %v49_v25  ;;  %v57_v28 = vmul.f32 %v55_v26, %v27_v0 }
  0x46   :  { %v62_v29 = vrot.slane %v50_v27, %v54_v21 }
  0x48   :  { %v64_v30 = vadd.f32 %v62_v29, %v57_v28 }
  0x4a   :  { %65 = vst [vmem:[#allocation5] sm:$0xff] %v64_v30 }
  0x4b   :  { %118 = shalt.err (!%p115_p12)
}
  0x4c   :  { %s119_s2 = scalar_lea.hbm %s188_s3, 128 }
  0x4d   :  { %p120_p13 = scmp.ne.s32.totalorder %s188_s3, %s119_s2  ;;  %p123_p0 = scmp.lt.u32.totalorder %s119_s2, %s188_s3 }
  0x4f   :  { %p125_p1 = pnand %p123_p0, %p120_p13 }
  0x51   :  { %128 = shalt.err (!%p125_p1)
}
  0x52   :  { %75 = dma.vmem_to_hbm [thread:$0]  %s73_s28, 128, %s188_s3, [#allocation4]  }
  0x53   :  { %131 = dma.done.wait [#allocation4], 128  }
  0x54   :  { %132 = vsyncadd [#allocation4], 4294967168 }
  0x55   :  { %79 = vsyncpa [#allocation3], 1 }
  0x56   :  { %80 = vsyncpa [#allocation4], 1 }

</bundles_post_ra>
